<compile_context>
chip_gen: v7x
topology: tpu7x:2x2x1
jax: 0.10.0
libtpu: 0.0.40
codegen_flags: <defaults>
</compile_context>

<pallas_src>
import math
import functools

import jax
import jax.numpy as jnp
from jax.experimental import pallas as pl
from jax.experimental.pallas import tpu as pltpu

# ---------------- configuration (small, deterministic) ----------------
B = 2            # batch
L = 16           # sequence length
VOCAB = 50       # args.VOCAB_SIZE
VOCAB_PAD = 64   # vocab padded to a layout-friendly multiple of 8
E = 32           # args.EMBEDDING_DIM
H = 32           # args.HIDDEN_DIM (must equal E for the reference to type-check)
CO = 4           # args.KERNEL_NUM
KS = (3, 4, 5)   # args.KERNEL_SIZES
C = 5            # args.NUM_CLASSES
KMAX = max(KS)


# ---------------- Pallas kernel: whole batch in one grid step ----------
def _cnn_lstm_kernel(ids_ref,                  # (B*L, 1) int32
                     embed_ref,                # (VOCAB_PAD, E)
                     wconv_ref, bconv_ref,     # (KMAX*E, 3*CO), (1, 3*CO)
                     mask_ref,                 # (B*L, 3*CO) f32 static valid mask
                     wfc1_ref, bfc1_ref,       # (3*CO, H), (1, H)
                     wsub_h_ref, wsub_a_ref,   # (H, C), (H, C)  (fc_sub pre-split)
                     bsub_ref,                 # (1, C)
                     out_ref,                  # (B, C)
                     *, batch, seq_len, hidden, kmax):
    bl = batch * seq_len
    emb_dim = embed_ref.shape[1]
    vocab = embed_ref.shape[0]

    # ---- embedding gather fused as one-hot @ table (single MXU push) ----
    ids = ids_ref[...]                                               # (B*L, 1)
    voc_iota = jax.lax.broadcasted_iota(jnp.int32, (bl, vocab), 1)
    onehot = jnp.where(voc_iota == ids, 1.0, 0.0)                    # (B*L, Vp) f32
    emb = jnp.dot(onehot, embed_ref[...],
                  preferred_element_type=jnp.float32)                # (B*L, E)

    # ---- CNN branch: im2col lag-stack, one fused matmul for all 3 branches ----
    pad = jnp.zeros((8, emb_dim), jnp.float32)
    emb_pad = jnp.concatenate([emb, pad], axis=0)                    # (B*L+8, E)
    x_lag = jnp.concatenate(
        [emb_pad[k:k + bl, :] for k in range(kmax)], axis=1)         # (B*L, KMAX*E)
    y = jnp.dot(x_lag, wconv_ref[...],
                preferred_element_type=jnp.float32) + bconv_ref[...]
    y = jnp.maximum(y, 0.0)                                          # (B*L, 3*CO)

    # per-branch valid-time mask (ReLU >= 0, so zeroing invalid / cross-batch
    # rows does not change the max over the valid rows).  Mask is precomputed
    # host-side, applied with one VPU multiply.
    y = y * mask_ref[...]                                            # (B*L, 3*CO)

    inv_sqrt_h = 1.0 / math.sqrt(hidden)
    pooled_rows = []
    att_rows = []
    for b in range(batch):                                           # B=2, unrolled
        lo = b * seq_len                                             # 8-aligned
        pooled_rows.append(
            jnp.max(y[lo:lo + seq_len, :], axis=0, keepdims=True))   # (1, 3*CO)

        emb_b = emb[lo:lo + seq_len, :]                              # (L, E)
        # self-attention on the raw embeddings; transposed contraction (no emb.T)
        s = jax.lax.dot_general(emb_b, emb_b, (((1,), (1,)), ((), ())),
                                preferred_element_type=jnp.float32) * inv_sqrt_h
        s = s - jnp.max(s, axis=-1, keepdims=True)
        p = jnp.exp(s)
        attn = p * pl.reciprocal(jnp.sum(p, axis=-1, keepdims=True), approx=True)
        a = jnp.dot(attn, emb_b, preferred_element_type=jnp.float32)  # (L, E)
        att_rows.append(jnp.max(a, axis=0, keepdims=True))            # (1, E)

    pooled = jnp.concatenate(pooled_rows, axis=0)                    # (B, 3*CO)
    att = jnp.concatenate(att_rows, axis=0)                          # (B, E)

    # fc1 (dropout is identity in eval) and fc_sub (weights pre-split in wrapper)
    h = jnp.dot(pooled, wfc1_ref[...],
                preferred_element_type=jnp.float32) + bfc1_ref[...]  # (B, H)
    logit = (jnp.dot(h, wsub_h_ref[...], preferred_element_type=jnp.float32)
             + jnp.dot(att, wsub_a_ref[...], preferred_element_type=jnp.float32)
             + bsub_ref[...])                                        # (B, C)
    out_ref[...] = logit


# ---------------- wrapper-side weight packing (done once) --------------
def pack_params(params):
    # conv weights: per-branch (K, E, CO) -> zero-pad to KMAX taps -> (KMAX*E, CO)
    w_blocks = []
    for i, K in enumerate(KS):
        w = params["w_conv"][i]                                      # (K, E, CO)
        if K < KMAX:
            w = jnp.concatenate(
                [w, jnp.zeros((KMAX - K, E, CO), jnp.float32)], axis=0)
        w_blocks.append(w.reshape(KMAX * E, CO))

    # embedding table padded to VOCAB_PAD rows (ids never index the pad rows)
    embed = params["embed"].astype(jnp.float32)
    embed = jnp.concatenate(
        [embed, jnp.zeros((VOCAB_PAD - VOCAB, E), jnp.float32)], axis=0)

    # static valid-time mask for the fused conv output, tiled over the batch:
    # branch with kernel K is valid for t in [0, L-K+1).
    mask_1b = jnp.concatenate(
        [(jnp.arange(L)[:, None] < (L - K + 1)).astype(jnp.float32)
         * jnp.ones((1, CO), jnp.float32) for K in KS], axis=1)      # (L, 3*CO)
    mask = jnp.tile(mask_1b, (B, 1))                                 # (B*L, 3*CO)

    return {
        "embed": embed,                                              # (VOCAB_PAD, E)
        "w_conv": jnp.concatenate(w_blocks, axis=1),                 # (KMAX*E, 3*CO)
        "b_conv": jnp.concatenate(params["b_conv"], axis=1),         # (1, 3*CO)
        "mask": mask,                                                # (B*L, 3*CO)
        "w_fc1": params["w_fc1"].reshape(len(KS) * CO, H),           # (3*CO, H)
        "b_fc1": params["b_fc1"],                                    # (1, H)
        "w_sub_h": params["w_sub"][:H, :],                           # (H, C)
        "w_sub_a": params["w_sub"][H:, :],                           # (H, C)
        "b_sub": params["b_sub"],                                    # (1, C)
    }


@jax.jit
def cnn_lstm_forward(token_ids, packed):
    ids2d = token_ids.reshape(B * L, 1).astype(jnp.int32)

    kernel = functools.partial(_cnn_lstm_kernel, batch=B, seq_len=L,
                               hidden=H, kmax=KMAX)

    def full(shape):
        return pl.BlockSpec(shape, lambda i: (0,) * len(shape))

    operands = (ids2d, packed["embed"], packed["w_conv"], packed["b_conv"],
                packed["mask"], packed["w_fc1"], packed["b_fc1"],
                packed["w_sub_h"], packed["w_sub_a"], packed["b_sub"])

    return pl.pallas_call(
        kernel,
        out_shape=jax.ShapeDtypeStruct((B, C), jnp.float32),
        grid=(1,),                                  # whole batch, one grid step
        in_specs=[full(op.shape) for op in operands],
        out_specs=pl.BlockSpec((B, C), lambda i: (0, 0)),
        compiler_params=pltpu.CompilerParams(
            dimension_semantics=("arbitrary",)),
    )(*operands)


# ---------------- pure-JAX reference for verification ------------------
def reference_forward(token_ids, params):
    emb = jnp.take(params["embed"], token_ids, axis=0).astype(jnp.float32)  # (B,L,E)
    feats = []
    for kidx, K in enumerate(KS):
        w = params["w_conv"][kidx]            # (K, E, CO)
        b = params["b_conv"][kidx]            # (1, CO)
        lout = L - K + 1
        y = sum(jnp.einsum("ble,eo->blo", emb[:, k:k + lout, :], w[k])
                for k in range(K)) + b
        y = jnp.maximum(y, 0.0)
        feats.append(jnp.max(y, axis=1))      # (B, CO)
    f = jnp.concatenate(feats, axis=-1)       # (B, len(KS)*CO)
    h = f @ params["w_fc1"].reshape(len(KS) * CO, H) + params["b_fc1"]

    s = jnp.einsum("ble,bme->blm", emb, emb) / math.sqrt(H)
    attn = jax.nn.softmax(s, axis=-1)
    a = jnp.einsum("blm,bme->ble", attn, emb)
    att = jnp.max(a, axis=1)                  # (B, E)

    feat = jnp.concatenate([h, att], axis=-1)
    return feat @ params["w_sub"] + params["b_sub"]


# ---------------- deterministic parameter init -------------------------
def init_params(key):
    keys = jax.random.split(key, 12)
    params = {
        "embed": 0.1 * jax.random.normal(keys[0], (VOCAB, E), jnp.float32),
        # conv weights stored as (K, E, CO) (torch: (CO, 1, K, E))
        "w_conv": [0.1 * jax.random.normal(keys[1 + i], (K, E, CO), jnp.float32)
                   for i, K in enumerate(KS)],
        "b_conv": [0.01 * jax.random.normal(keys[4 + i], (1, CO), jnp.float32)
                   for i in range(len(KS))],
        # fc1 weight stored transposed & split per conv branch: (len(KS), CO, H)
        "w_fc1": 0.1 * jax.random.normal(keys[7], (len(KS), CO, H), jnp.float32),
        "b_fc1": 0.01 * jax.random.normal(keys[8], (1, H), jnp.float32),
        # fc_sub weight stored transposed: (2H, C)
        "w_sub": 0.1 * jax.random.normal(keys[9], (2 * H, C), jnp.float32),
        "b_sub": 0.01 * jax.random.normal(keys[10], (1, C), jnp.float32),
    }
    return params


if __name__ == "__main__":
    key = jax.random.PRNGKey(0)
    k_tok, k_par = jax.random.split(key)
    token_ids = jax.random.randint(k_tok, (B, L), 0, VOCAB, dtype=jnp.int32)
    params = init_params(k_par)
    packed = pack_params(params)

    out = jax.block_until_ready(cnn_lstm_forward(token_ids, packed))
    ref = jax.block_until_ready(reference_forward(token_ids, params))

    assert out.shape == (B, C), out.shape
    assert jnp.allclose(out, ref, rtol=2e-3, atol=2e-3), (out, ref)

    print("KERNEL_OK")
</pallas_src>

<mosaic_0001>
module attributes {stable_mosaic.version = 11 : i64} {
  func.func @_cnn_lstm_kernel(%arg0: i32, %arg1: memref<32x1xi32, #tpu.memory_space<vmem>>, %arg2: memref<64x32xf32, #tpu.memory_space<vmem>>, %arg3: memref<160x12xf32, #tpu.memory_space<vmem>>, %arg4: memref<1x12xf32, #tpu.memory_space<vmem>>, %arg5: memref<32x12xf32, #tpu.memory_space<vmem>>, %arg6: memref<12x32xf32, #tpu.memory_space<vmem>>, %arg7: memref<1x32xf32, #tpu.memory_space<vmem>>, %arg8: memref<32x5xf32, #tpu.memory_space<vmem>>, %arg9: memref<32x5xf32, #tpu.memory_space<vmem>>, %arg10: memref<1x5xf32, #tpu.memory_space<vmem>>, %arg11: memref<2x5xf32, #tpu.memory_space<vmem>>) attributes {dimension_semantics = [#tpu.dimension_semantics<arbitrary>], iteration_bounds = array<i64: 1>, scalar_prefetch = 0 : i64, scratch_operands = 0 : i64, tpu.core_type = #tpu.core_type<tc>, window_params = [{pipeline_mode = #tpu.pipeline_mode<synchronous>, transform_indices = @transform_0, window_bounds = array<i64: 32, 1>}, {pipeline_mode = #tpu.pipeline_mode<synchronous>, transform_indices = @transform_1, window_bounds = array<i64: 64, 32>}, {pipeline_mode = #tpu.pipeline_mode<synchronous>, transform_indices = @transform_2, window_bounds = array<i64: 160, 12>}, {pipeline_mode = #tpu.pipeline_mode<synchronous>, transform_indices = @transform_3, window_bounds = array<i64: 1, 12>}, {pipeline_mode = #tpu.pipeline_mode<synchronous>, transform_indices = @transform_4, window_bounds = array<i64: 32, 12>}, {pipeline_mode = #tpu.pipeline_mode<synchronous>, transform_indices = @transform_5, window_bounds = array<i64: 12, 32>}, {pipeline_mode = #tpu.pipeline_mode<synchronous>, transform_indices = @transform_6, window_bounds = array<i64: 1, 32>}, {pipeline_mode = #tpu.pipeline_mode<synchronous>, transform_indices = @transform_7, window_bounds = array<i64: 32, 5>}, {pipeline_mode = #tpu.pipeline_mode<synchronous>, transform_indices = @transform_8, window_bounds = array<i64: 32, 5>}, {pipeline_mode = #tpu.pipeline_mode<synchronous>, transform_indices = @transform_9, window_bounds = array<i64: 1, 5>}, {pipeline_mode = #tpu.pipeline_mode<synchronous>, transform_indices = @transform_10, window_bounds = array<i64: 2, 5>}]} {
    %c0 = arith.constant 0 : index
    %c0_0 = arith.constant 0 : index
    %0 = vector.load %arg1[%c0, %c0_0] : memref<32x1xi32, #tpu.memory_space<vmem>>, vector<32x1xi32>
    %1 = tpu.iota {dimensions = array<i32: 1>} : vector<32x64xi32>
    %2 = vector.broadcast %0 : vector<32x1xi32> to vector<32x64xi32>
    %3 = arith.cmpi eq, %1, %2 : vector<32x64xi32>
    %cst = arith.constant 1.000000e+00 : f32
    %cst_1 = arith.constant 0.000000e+00 : f32
    %4 = vector.broadcast %cst : f32 to vector<32x64xf32>
    %5 = vector.broadcast %cst_1 : f32 to vector<32x64xf32>
    %6 = arith.select %3, %4, %5 : vector<32x64xi1>, vector<32x64xf32>
    %c0_2 = arith.constant 0 : index
    %c0_3 = arith.constant 0 : index
    %7 = vector.load %arg2[%c0_2, %c0_3] : memref<64x32xf32, #tpu.memory_space<vmem>>, vector<64x32xf32>
    %cst_4 = arith.constant dense<0.000000e+00> : vector<32x32xf32>
    %8 = tpu.matmul %6, %7, %cst_4 {dimension_numbers = #tpu.dot_dimension_numbers<[1], [0], [0], [1], [0, 0, 1, 1], [], []>} : vector<32x64xf32>, vector<64x32xf32>, vector<32x32xf32> -> vector<32x32xf32>
    %cst_5 = arith.constant 0.000000e+00 : f32
    %9 = vector.broadcast %cst_5 : f32 to vector<8x32xf32>
    %10 = tpu.concatenate %8, %9 in 0 : vector<32x32xf32>, vector<8x32xf32> -> vector<40x32xf32>
    %11 = vector.extract_strided_slice %10 {offsets = [0, 0], sizes = [32, 32], strides = [1, 1]} : vector<40x32xf32> to vector<32x32xf32>
    %12 = vector.extract_strided_slice %10 {offsets = [1, 0], sizes = [32, 32], strides = [1, 1]} : vector<40x32xf32> to vector<32x32xf32>
    %13 = vector.extract_strided_slice %10 {offsets = [2, 0], sizes = [32, 32], strides = [1, 1]} : vector<40x32xf32> to vector<32x32xf32>
    %14 = vector.extract_strided_slice %10 {offsets = [3, 0], sizes = [32, 32], strides = [1, 1]} : vector<40x32xf32> to vector<32x32xf32>
    %15 = vector.extract_strided_slice %10 {offsets = [4, 0], sizes = [32, 32], strides = [1, 1]} : vector<40x32xf32> to vector<32x32xf32>
    %16 = tpu.concatenate %11, %12, %13, %14, %15 in 1 : vector<32x32xf32>, vector<32x32xf32>, vector<32x32xf32>, vector<32x32xf32>, vector<32x32xf32> -> vector<32x160xf32>
    %c0_6 = arith.constant 0 : index
    %c0_7 = arith.constant 0 : index
    %17 = vector.load %arg3[%c0_6, %c0_7] : memref<160x12xf32, #tpu.memory_space<vmem>>, vector<160x12xf32>
    %cst_8 = arith.constant dense<0.000000e+00> : vector<32x12xf32>
    %18 = tpu.matmul %16, %17, %cst_8 {dimension_numbers = #tpu.dot_dimension_numbers<[1], [0], [0], [1], [0, 0, 1, 1], [], []>} : vector<32x160xf32>, vector<160x12xf32>, vector<32x12xf32> -> vector<32x12xf32>
    %c0_9 = arith.constant 0 : index
    %c0_10 = arith.constant 0 : index
    %19 = vector.load %arg4[%c0_9, %c0_10] : memref<1x12xf32, #tpu.memory_space<vmem>>, vector<1x12xf32>
    %20 = vector.broadcast %19 : vector<1x12xf32> to vector<32x12xf32>
    %21 = arith.addf %18, %20 : vector<32x12xf32>
    %cst_11 = arith.constant 0.000000e+00 : f32
    %22 = vector.broadcast %cst_11 : f32 to vector<32x12xf32>
    %23 = arith.maximumf %21, %22 : vector<32x12xf32>
    %c0_12 = arith.constant 0 : index
    %c0_13 = arith.constant 0 : index
    %24 = vector.load %arg5[%c0_12, %c0_13] : memref<32x12xf32, #tpu.memory_space<vmem>>, vector<32x12xf32>
    %25 = arith.mulf %23, %24 : vector<32x12xf32>
    %26 = vector.extract_strided_slice %25 {offsets = [0, 0], sizes = [16, 12], strides = [1, 1]} : vector<32x12xf32> to vector<16x12xf32>
    %cst_14 = arith.constant dense<0xFF800000> : vector<12xf32>
    %27 = vector.multi_reduction <maximumf>, %26, %cst_14 [0] : vector<16x12xf32> to vector<12xf32>
    %28 = vector.shape_cast %27 : vector<12xf32> to vector<1x12xf32>
    %29 = vector.extract_strided_slice %8 {offsets = [0, 0], sizes = [16, 32], strides = [1, 1]} : vector<32x32xf32> to vector<16x32xf32>
    %cst_15 = arith.constant dense<0.000000e+00> : vector<16x16xf32>
    %30 = tpu.matmul %29, %29, %cst_15 {dimension_numbers = #tpu.dot_dimension_numbers<[1], [1], [0], [0], [0, 0, 1, 0], [], []>} : vector<16x32xf32>, vector<16x32xf32>, vector<16x16xf32> -> vector<16x16xf32>
    %cst_16 = arith.constant 0.176776692 : f32
    %31 = vector.broadcast %cst_16 : f32 to vector<16x16xf32>
    %32 = arith.mulf %30, %31 : vector<16x16xf32>
    %cst_17 = arith.constant dense<0xFF800000> : vector<16xf32>
    %33 = vector.multi_reduction <maximumf>, %32, %cst_17 [1] : vector<16x16xf32> to vector<16xf32>
    %34 = vector.shape_cast %33 : vector<16xf32> to vector<16x1xf32>
    %35 = vector.broadcast %34 : vector<16x1xf32> to vector<16x16xf32>
    %36 = arith.subf %32, %35 : vector<16x16xf32>
    %37 = math.exp %36 : vector<16x16xf32>
    %cst_18 = arith.constant dense<0.000000e+00> : vector<16xf32>
    %38 = vector.multi_reduction <add>, %37, %cst_18 [1] : vector<16x16xf32> to vector<16xf32>
    %39 = vector.shape_cast %38 : vector<16xf32> to vector<16x1xf32>
    %40 = tpu.reciprocal %39 {approx = true} : vector<16x1xf32> -> vector<16x1xf32>
    %41 = vector.broadcast %40 : vector<16x1xf32> to vector<16x16xf32>
    %42 = arith.mulf %37, %41 : vector<16x16xf32>
    %cst_19 = arith.constant dense<0.000000e+00> : vector<16x32xf32>
    %43 = tpu.matmul %42, %29, %cst_19 {dimension_numbers = #tpu.dot_dimension_numbers<[1], [0], [0], [1], [0, 0, 1, 1], [], []>} : vector<16x16xf32>, vector<16x32xf32>, vector<16x32xf32> -> vector<16x32xf32>
    %cst_20 = arith.constant dense<0xFF800000> : vector<32xf32>
    %44 = vector.multi_reduction <maximumf>, %43, %cst_20 [0] : vector<16x32xf32> to vector<32xf32>
    %45 = vector.shape_cast %44 : vector<32xf32> to vector<1x32xf32>
    %46 = vector.extract_strided_slice %25 {offsets = [16, 0], sizes = [16, 12], strides = [1, 1]} : vector<32x12xf32> to vector<16x12xf32>
    %cst_21 = arith.constant dense<0xFF800000> : vector<12xf32>
    %47 = vector.multi_reduction <maximumf>, %46, %cst_21 [0] : vector<16x12xf32> to vector<12xf32>
    %48 = vector.shape_cast %47 : vector<12xf32> to vector<1x12xf32>
    %49 = vector.extract_strided_slice %8 {offsets = [16, 0], sizes = [16, 32], strides = [1, 1]} : vector<32x32xf32> to vector<16x32xf32>
    %cst_22 = arith.constant dense<0.000000e+00> : vector<16x16xf32>
    %50 = tpu.matmul %49, %49, %cst_22 {dimension_numbers = #tpu.dot_dimension_numbers<[1], [1], [0], [0], [0, 0, 1, 0], [], []>} : vector<16x32xf32>, vector<16x32xf32>, vector<16x16xf32> -> vector<16x16xf32>
    %cst_23 = arith.constant 0.176776692 : f32
    %51 = vector.broadcast %cst_23 : f32 to vector<16x16xf32>
    %52 = arith.mulf %50, %51 : vector<16x16xf32>
    %cst_24 = arith.constant dense<0xFF800000> : vector<16xf32>
    %53 = vector.multi_reduction <maximumf>, %52, %cst_24 [1] : vector<16x16xf32> to vector<16xf32>
    %54 = vector.shape_cast %53 : vector<16xf32> to vector<16x1xf32>
    %55 = vector.broadcast %54 : vector<16x1xf32> to vector<16x16xf32>
    %56 = arith.subf %52, %55 : vector<16x16xf32>
    %57 = math.exp %56 : vector<16x16xf32>
    %cst_25 = arith.constant dense<0.000000e+00> : vector<16xf32>
    %58 = vector.multi_reduction <add>, %57, %cst_25 [1] : vector<16x16xf32> to vector<16xf32>
    %59 = vector.shape_cast %58 : vector<16xf32> to vector<16x1xf32>
    %60 = tpu.reciprocal %59 {approx = true} : vector<16x1xf32> -> vector<16x1xf32>
    %61 = vector.broadcast %60 : vector<16x1xf32> to vector<16x16xf32>
    %62 = arith.mulf %57, %61 : vector<16x16xf32>
    %cst_26 = arith.constant dense<0.000000e+00> : vector<16x32xf32>
    %63 = tpu.matmul %62, %49, %cst_26 {dimension_numbers = #tpu.dot_dimension_numbers<[1], [0], [0], [1], [0, 0, 1, 1], [], []>} : vector<16x16xf32>, vector<16x32xf32>, vector<16x32xf32> -> vector<16x32xf32>
    %cst_27 = arith.constant dense<0xFF800000> : vector<32xf32>
    %64 = vector.multi_reduction <maximumf>, %63, %cst_27 [0] : vector<16x32xf32> to vector<32xf32>
    %65 = vector.shape_cast %64 : vector<32xf32> to vector<1x32xf32>
    %66 = tpu.concatenate %28, %48 in 0 : vector<1x12xf32>, vector<1x12xf32> -> vector<2x12xf32>
    %67 = tpu.concatenate %45, %65 in 0 : vector<1x32xf32>, vector<1x32xf32> -> vector<2x32xf32>
    %c0_28 = arith.constant 0 : index
    %c0_29 = arith.constant 0 : index
    %68 = vector.load %arg6[%c0_28, %c0_29] : memref<12x32xf32, #tpu.memory_space<vmem>>, vector<12x32xf32>
    %cst_30 = arith.constant dense<0.000000e+00> : vector<2x32xf32>
    %69 = tpu.matmul %66, %68, %cst_30 {dimension_numbers = #tpu.dot_dimension_numbers<[1], [0], [0], [1], [0, 0, 1, 1], [], []>} : vector<2x12xf32>, vector<12x32xf32>, vector<2x32xf32> -> vector<2x32xf32>
    %c0_31 = arith.constant 0 : index
    %c0_32 = arith.constant 0 : index
    %70 = vector.load %arg7[%c0_31, %c0_32] : memref<1x32xf32, #tpu.memory_space<vmem>>, vector<1x32xf32>
    %71 = vector.broadcast %70 : vector<1x32xf32> to vector<2x32xf32>
    %72 = arith.addf %69, %71 : vector<2x32xf32>
    %c0_33 = arith.constant 0 : index
    %c0_34 = arith.constant 0 : index
    %73 = vector.load %arg8[%c0_33, %c0_34] : memref<32x5xf32, #tpu.memory_space<vmem>>, vector<32x5xf32>
    %cst_35 = arith.constant dense<0.000000e+00> : vector<2x5xf32>
    %74 = tpu.matmul %72, %73, %cst_35 {dimension_numbers = #tpu.dot_dimension_numbers<[1], [0], [0], [1], [0, 0, 1, 1], [], []>} : vector<2x32xf32>, vector<32x5xf32>, vector<2x5xf32> -> vector<2x5xf32>
    %c0_36 = arith.constant 0 : index
    %c0_37 = arith.constant 0 : index
    %75 = vector.load %arg9[%c0_36, %c0_37] : memref<32x5xf32, #tpu.memory_space<vmem>>, vector<32x5xf32>
    %cst_38 = arith.constant dense<0.000000e+00> : vector<2x5xf32>
    %76 = tpu.matmul %67, %75, %cst_38 {dimension_numbers = #tpu.dot_dimension_numbers<[1], [0], [0], [1], [0, 0, 1, 1], [], []>} : vector<2x32xf32>, vector<32x5xf32>, vector<2x5xf32> -> vector<2x5xf32>
    %77 = arith.addf %74, %76 : vector<2x5xf32>
    %c0_39 = arith.constant 0 : index
    %c0_40 = arith.constant 0 : index
    %78 = vector.load %arg10[%c0_39, %c0_40] : memref<1x5xf32, #tpu.memory_space<vmem>>, vector<1x5xf32>
    %79 = vector.broadcast %78 : vector<1x5xf32> to vector<2x5xf32>
    %80 = arith.addf %77, %79 : vector<2x5xf32>
    %c0_41 = arith.constant 0 : index
    %c0_42 = arith.constant 0 : index
    %81 = vector.load %arg11[%c0_41, %c0_42] : memref<2x5xf32, #tpu.memory_space<vmem>>, vector<2x5xf32>
    tpu.vector_store %arg11[%c0_41, %c0_42], %80 {strides = array<i32>} : memref<2x5xf32, #tpu.memory_space<vmem>>, vector<2x5xf32>,
    return
  }
  func.func @transform_0(%arg0: i32) -> (i32, i32) {
    %c0_i32 = arith.constant 0 : i32
    %c0_i32_0 = arith.constant 0 : i32
    %c0_i32_1 = arith.constant 0 : i32
    return %c0_i32, %c0_i32_0 : i32, i32
  }
  func.func @transform_1(%arg0: i32) -> (i32, i32) {
    %c0_i32 = arith.constant 0 : i32
    %c0_i32_0 = arith.constant 0 : i32
    %c0_i32_1 = arith.constant 0 : i32
    return %c0_i32, %c0_i32_0 : i32, i32
  }
  func.func @transform_2(%arg0: i32) -> (i32, i32) {
    %c0_i32 = arith.constant 0 : i32
    %c0_i32_0 = arith.constant 0 : i32
    %c0_i32_1 = arith.constant 0 : i32
    return %c0_i32, %c0_i32_0 : i32, i32
  }
  func.func @transform_3(%arg0: i32) -> (i32, i32) {
    %c0_i32 = arith.constant 0 : i32
    %c0_i32_0 = arith.constant 0 : i32
    %c0_i32_1 = arith.constant 0 : i32
    return %c0_i32, %c0_i32_0 : i32, i32
  }
  func.func @transform_4(%arg0: i32) -> (i32, i32) {
    %c0_i32 = arith.constant 0 : i32
    %c0_i32_0 = arith.constant 0 : i32
    %c0_i32_1 = arith.constant 0 : i32
    return %c0_i32, %c0_i32_0 : i32, i32
  }
  func.func @transform_5(%arg0: i32) -> (i32, i32) {
    %c0_i32 = arith.constant 0 : i32
    %c0_i32_0 = arith.constant 0 : i32
    %c0_i32_1 = arith.constant 0 : i32
    return %c0_i32, %c0_i32_0 : i32, i32
  }
  func.func @transform_6(%arg0: i32) -> (i32, i32) {
    %c0_i32 = arith.constant 0 : i32
    %c0_i32_0 = arith.constant 0 : i32
    %c0_i32_1 = arith.constant 0 : i32
    return %c0_i32, %c0_i32_0 : i32, i32
  }
  func.func @transform_7(%arg0: i32) -> (i32, i32) {
    %c0_i32 = arith.constant 0 : i32
    %c0_i32_0 = arith.constant 0 : i32
    %c0_i32_1 = arith.constant 0 : i32
    return %c0_i32, %c0_i32_0 : i32, i32
  }
  func.func @transform_8(%arg0: i32) -> (i32, i32) {
    %c0_i32 = arith.constant 0 : i32
    %c0_i32_0 = arith.constant 0 : i32
    %c0_i32_1 = arith.constant 0 : i32
    return %c0_i32, %c0_i32_0 : i32, i32
  }
  func.func @transform_9(%arg0: i32) -> (i32, i32) {
    %c0_i32 = arith.constant 0 : i32
    %c0_i32_0 = arith.constant 0 : i32
    %c0_i32_1 = arith.constant 0 : i32
    return %c0_i32, %c0_i32_0 : i32, i32
  }
  func.func @transform_10(%arg0: i32) -> (i32, i32) {
    %c0_i32 = arith.constant 0 : i32
    %c0_i32_0 = arith.constant 0 : i32
    %c0_i32_1 = arith.constant 0 : i32
    return %c0_i32, %c0_i32_0 : i32, i32
  }
}

</mosaic_0001>

<bundles_post_ra>
// kernel: cnn_lstm_forward.1
= control target key start
LH: loop header
LB: loop body
LE: loop exit
PB: predicated region body
PF: predicated region fallthrough
CT: control target
= control target key end

     0   :  { %v1362_v2 = vmov 0   ;;  %s1779_s0 = inlined_call_operand.vmem [shape: s32[32,1], index: 0, kind: input, shape index: {}]   ;;  %s1780_s1 = inlined_call_operand.vmem [shape: f32[64,32], index: 1, kind: input, shape index: {}]   ;;  %s1781_s2 = inlined_call_operand.vmem [shape: f32[160,12], index: 2, kind: input, shape index: {}]   ;;  %s1782_s3 = inlined_call_operand.vmem [shape: f32[1,12], index: 3, kind: input, shape index: {}]   ;;  %s1783_s4 = inlined_call_operand.vmem [shape: f32[32,12], index: 4, kind: input, shape index: {}]   ;;  %s1784_s5 = inlined_call_operand.vmem [shape: f32[12,32], index: 5, kind: input, shape index: {}]   ;;  %s1785_s6 = inlined_call_operand.vmem [shape: f32[1,32], index: 6, kind: input, shape index: {}]   ;;  %s1786_s7 = inlined_call_operand.vmem [shape: f32[32,5], index: 7, kind: input, shape index: {}]   ;;  %s1787_s8 = inlined_call_operand.vmem [shape: f32[32,5], index: 8, kind: input, shape index: {}]   ;;  %s1788_s9 = inlined_call_operand.vmem [shape: f32[1,5], index: 9, kind: input, shape index: {}]   ;;  %s1789_s10 = inlined_call_operand.hbm [shape: f32[2,5], index: 10, kind: output, shape index: {}]  }
   0x1   :  { %v36_v0 = vld [vmem:[%s1779_s0] sm:$0xff]  ;;  %v38_v1 = vld [vmem:[%s1779_s0 + $0x10] sm:$0xff]  ;;  %1305 = vset.pattern.permute.xlu0 %v1362_v2  ;;  %1306 = vset.pattern.permute.xlu1 %v1362_v2  ;;  %v63_v4 = vld [vmem:[%s1780_s1 + $0x8] sm:$0xff] }
   0x2   :  { %v62_v3 = vld [vmem:[%s1780_s1] sm:$0xff]  ;;  %43 = vperm.xlu0 %1305, %v36_v0   ;;  %49 = vperm.xlu1 %1306, %v38_v1   ;;  %v37_v5 = vld [vmem:[%s1779_s0 + $0x8] sm:$0xff]  ;;  %v64_v7 = vld [vmem:[%s1780_s1 + $0x10] sm:$0xff] }
   0x3   :  { %v1214_v6 = vpack.c.bf16 %v63_v4, %v62_v3  ;;  %v65_v8 = vld [vmem:[%s1780_s1 + $0x18] sm:$0xff]  ;;  %v66_v11 = vld [vmem:[%s1780_s1 + $0x20] sm:$0xff]  ;;  %v67_v12 = vld [vmem:[%s1780_s1 + $0x28] sm:$0xff] }
   0x4   :  { %v39_v9 = vld [vmem:[%s1779_s0 + $0x18] sm:$0xff]  ;;  %v1218_v10 = vpack.c.bf16 %v65_v8, %v64_v7 }
   0x5   :  { %1215 = vmatprep.subr.bf16.mxu0 %v1214_v6 }
   0x6   :  { %15 = vsyncpa [#allocation3], 0  ;;  %1217 = vmatpush3.bf16.msra.mxu0 %v1214_v6  ;;  %46 = vperm.xlu0 %1305, %v37_v5   ;;  %v1222_v13 = vpack.c.bf16 %v67_v12, %v66_v11  ;;  %v68_v14 = vld [vmem:[%s1780_s1 + $0x30] sm:$0xff]  ;;  %v69_v15 = vld [vmem:[%s1780_s1 + $0x38] sm:$0xff]  ;;  %v40_v17 = vlaneseq  ;;  %vm70_vm0 = vcmask 523264   ;;  %v1363_v21 = vmov 0.0  }
   0x7   :  { %52 = vperm.xlu1 %1306, %v39_v9   ;;  %1219 = vmatprep.subr.bf16.mxu0 %v1218_v10  ;;  %v1226_v16 = vpack.c.bf16 %v69_v15, %v68_v14  ;;  %vm249_vm5 = vcmask 261120   ;;  %vm239_vm6 = vcmask 1043456   ;;  %vm173_vm7 = vcmask 1046528   ;;  %s1364_s1 = smov 32   ;;  %s1365_s16 = smov 96   ;;  %v264_v11 = vld [vmem:[%s1781_s2 + $0x8] sm:$0xff] }
   0x8   :  { %v41_v18 = vand.u32 127, %v40_v17  ;;  %vm217_vm8 = vcmask 1044480   ;;  %vm195_vm9 = vcmask 1045504   ;;  %vm1476_vm10 = vmpackc.low %vm249_vm5, %vm249_vm5  ;;  %vm486_vm11 = vcmask 130048   ;;  %s1366_s17 = smov 64   ;;  %v265_v12 = vld [vmem:[%s1781_s2 + $0x10] sm:$0xff] }
   0x9   :  { %v203_v8 = vrot.slane %v1363_v21, 2  ;;  %v266_v15 = vld [vmem:[%s1781_s2 + $0x18] sm:$0xff]  ;;  %v267_v17 = vld [vmem:[%s1781_s2 + $0x20] sm:$0xff]  ;;  %vm258_vm12 = vcmask 785408   ;;  %vm395_vm13 = vcmask 97280   ;;  %vm801_vm14 = vcmask 1040384  }
   0xa   :  { %1221 = vmatpush3.bf16.msra.mxu0 %v1218_v10  ;;  %v263_v10 = vld [vmem:[%s1781_s2] sm:$0xff]  ;;  %vm1368_vm15 = vmmov 0   ;;  %s1370_s21 = smov [#allocation2]  }
   0xb   :  { %1223 = vmatprep.subr.bf16.mxu0 %v1222_v13  ;;  %v1231_v14 = vpack.c.bf16 %v264_v11, %v263_v10 }
   0xe   :  { %1225 = vmatpush3.bf16.msra.mxu0 %v1222_v13  ;;  %v1367_v13 = vmov 0.0|0.0  }
   0xf   :  { %1227 = vmatprep.subr.bf16.mxu0 %v1226_v16  ;;  %1230 = vmatprep.subr.bf16.mxu1 %v1367_v13 }
  0x10   :  { %1232 = vmatpush1.bf16.msra.mxu1 %v1231_v14 }
  0x11   :  { %1233 = vmatprep.subr.bf16.mxu1 %v1367_v13 }
  0x12   :  { %1229 = vmatpush3.bf16.msra.mxu0 %v1226_v16  ;;  %v1234_v16 = vpack.c.bf16 %v266_v15, %v265_v12 }
  0x14   :  { %1235 = vmatpush1.bf16.msra.mxu1 %v1234_v16 }
  0x15   :  { %1236 = vmatprep.subr.bf16.mxu1 %v1367_v13 }
  0x81   :  { %v44_v19 = vpop.permute.xlu0 %43  ;;  %v50_v20 = vpop.permute.xlu1 %49 }
  0x82   :  { %vm54_vm1 = vcmp.eq.s32.totalorder %v41_v18, %v44_v19  ;;  %vm56_vm2 = vcmp.eq.s32.totalorder %v41_v18, %v50_v20  ;;  %v269_v20 = vld [vmem:[%s1781_s2 + $0x30] sm:$0xff] }
  0x83   :  { %v58_v22 = vsel %vm54_vm1, 1.0, %v1363_v21  ;;  %v60_v25 = vsel %vm56_vm2, 1.0, %v1363_v21  ;;  %vm1051_vm2 = vcmask 33792  }
  0x84   :  { %1151 = vmatprep.mubr.msk.f32.mxu0 %vm70_vm0, %v58_v22  ;;  %v270_v22 = vld [vmem:[%s1781_s2 + $0x38] sm:$0xff] }
  0x85   :  { %v47_v23 = vpop.permute.xlu0 %46 }
  0x86   :  { %v53_v24 = vpop.permute.xlu1 %52  ;;  %vm55_vm3 = vcmp.eq.s32.totalorder %v41_v18, %v47_v23  ;;  %v1240_v23 = vpack.c.bf16 %v270_v22, %v269_v20 }
  0x87   :  { %vm57_vm4 = vcmp.eq.s32.totalorder %v41_v18, %v53_v24  ;;  %v59_v26 = vsel %vm55_vm3, 1.0, %v1363_v21  ;;  %v268_v18 = vld [vmem:[%s1781_s2 + $0x28] sm:$0xff]  ;;  %v271_v24 = vld [vmem:[%s1781_s2 + $0x40] sm:$0xff] }
  0x88   :  { %1152 = vmatmul.mubr.msk.f32.vlgmr.msra.gmra.mrb[0].mxu0 %vm70_vm0, %v59_v26  ;;  %v61_v27 = vsel %vm57_vm4, 1.0, %v1363_v21  ;;  %v1237_v19 = vpack.c.bf16 %v268_v18, %v267_v17 }
  0x89   :  { %1154 = vmatprep.mubr.msk.f32.mxu0 %vm70_vm0, %v60_v25  ;;  %v272_v25 = vld [vmem:[%s1781_s2 + $0x48] sm:$0xff] }
  0x8a   :  { %1238 = vmatpush1.bf16.msra.mxu1 %v1237_v19  ;;  %v1243_v26 = vpack.c.bf16 %v272_v25, %v271_v24 }
  0x8b   :  { %1239 = vmatprep.subr.bf16.mxu1 %v1367_v13 }
  0x8c   :  { %1155 = vmatmul.mubr.msk.f32.gmra.mrb[2].mxu0 %vm70_vm0, %v61_v27  ;;  %v273_v27 = vld [vmem:[%s1781_s2 + $0x50] sm:$0xff] }
  0x8e   :  { %1241 = vmatpush1.bf16.msra.mxu1 %v1240_v23 }
  0x8f   :  { %1242 = vmatprep.subr.bf16.mxu1 %v1367_v13 }
  0x92   :  { %1244 = vmatpush1.bf16.msra.mxu1 %v1243_v26 }
  0x93   :  { %1245 = vmatprep.subr.bf16.mxu1 %v1367_v13 }
 0x15b   :  { %v1470_v28 = vpop.f32.mrb[0].mxu0 }
 0x15c   :  { %v1472_v29 = vpop.f32.mrb[1].mxu0  ;;  %v241_v31 = vrot.slane %v1470_v28, 4  ;;  %v175_v32 = vrot.slane %v1470_v28, 1  ;;  %v219_v33 = vrot.slane %v1470_v28, 3  ;;  %v197_v34 = vrot.slane %v1470_v28, 2 }
 0x15d   :  { %1161 = vmatprep.mubr.msk.f32.mxu0 %vm249_vm5, %v1472_v29  ;;  %v1260_v35 = vpack.c.bf16 %v1470_v28, %v1472_v29  ;;  %v240_v36 = vrot.slane %v1472_v29, 4  ;;  %v174_v37 = vrot.slane %v1472_v29, 1  ;;  %v218_v38 = vrot.slane %v1472_v29, 3 }
 0x15e   :  { %v196_v39 = vrot.slane %v1472_v29, 2 }
 0x15f   :  { %v1492_v40 = vpop.f32.mrb[2].mxu0  ;;  %1262 = vmatprep.subr.msk.bf16.mxu0 %vm1476_vm10, %v1260_v35  ;;  %v242_v41 = vsel %vm239_vm6, %v240_v36, %v241_v31  ;;  %v176_v42 = vsel %vm173_vm7, %v174_v37, %v175_v32  ;;  %v220_v43 = vsel %vm217_vm8, %v218_v38, %v219_v33 }
 0x160   :  { %v1499_v44 = vpop.f32.mrb[3].mxu0  ;;  %1072 = vmatprep.mubr.msk.f32.mxu1 %vm249_vm5, %v242_v41  ;;  %1265 = vmatpush3.bf16.xpose.msk.msra.mxu0 %vm1476_vm10, %v1260_v35  ;;  %v1505_v45 = vsel %vm195_vm9, %v196_v39, %v197_v34  ;;  %v179_v58 = vrot.slane %v1492_v40, 1  ;;  %v223_v59 = vrot.slane %v1492_v40, 3  ;;  %v201_v60 = vrot.slane %v1492_v40, 2 }
 0x161   :  { %1267 = vmatprep.subr.bf16.mxu0 %v1260_v35  ;;  %v1509_v46 = vpack.c.bf16 %v1492_v40, %v1499_v44  ;;  %v177_v47 = vrot.slane %v1499_v44, 1  ;;  %v221_v48 = vrot.slane %v1499_v44, 3  ;;  %v199_v49 = vrot.slane %v1499_v44, 2 }
 0x162   :  { %v243_v50 = vrot.slane %v1499_v44, 4  ;;  %v245_v61 = vrot.slane %v1492_v40, 4  ;;  %v204_v9 = vsel %vm195_vm9, %v201_v60, %v203_v8 }
 0x163   :  { %v178_v51 = vsel %vm173_vm7, %v175_v32, %v177_v47  ;;  %v222_v52 = vsel %vm217_vm8, %v219_v33, %v221_v48  ;;  %v1518_v53 = vsel %vm195_vm9, %v197_v34, %v199_v49  ;;  %v180_v62 = vsel %vm173_vm7, %v177_v47, %v179_v58  ;;  %v275_v33 = vld [vmem:[%s1781_s2 + $0x60] sm:$0xff]  ;;  %v276_v34 = vld [vmem:[%s1781_s2 + $0x68] sm:$0xff] }
 0x164   :  { %v1307_v54 = vpack.i.bf16 %v178_v51, %v176_v42  ;;  %v1317_v55 = vpack.i.bf16 %v222_v52, %v220_v43  ;;  %v1312_v56 = vpack.i.bf16 %v1518_v53, %v1505_v45  ;;  %v1523_v57 = vsel %vm239_vm6, %v241_v31, %v243_v50  ;;  %v274_v31 = vld [vmem:[%s1781_s2 + $0x58] sm:$0xff] }
 0x165   :  { %v224_v63 = vsel %vm217_vm8, %v221_v48, %v223_v59  ;;  %v1541_v0 = vsel %vm195_vm9, %v199_v49, %v201_v60  ;;  %v1546_v1 = vsel %vm239_vm6, %v243_v50, %v245_v61  ;;  %v1246_v32 = vpack.c.bf16 %v274_v31, %v273_v27  ;;  %v277_v50 = vld [vmem:[%s1781_s2 + $0x70] sm:$0xff]  ;;  %v278_v51 = vld [vmem:[%s1781_s2 + $0x78] sm:$0xff] }
 0x166   :  { %v1252_v52 = vpack.c.bf16 %v278_v51, %v277_v50  ;;  %v247_v31 = vrot.slane %v1363_v21, 4 }
 0x167   :  { %1162 = vmatmul.mubr.msk.f32.vlgmr.msra.gmra.mrb[4].mxu0 %vm249_vm5, %v1470_v28  ;;  %1247 = vmatpush1.bf16.msra.mxu1 %v1246_v32 }
 0x168   :  { %1269 = vmatpush3.bf16.msra.mxu0 %v1260_v35  ;;  %v1249_v35 = vpack.c.bf16 %v276_v34, %v275_v33  ;;  %1248 = vmatprep.subr.bf16.mxu1 %v1367_v13 }
 0x169   :  { %1272 = vmatprep.subr.msk.bf16.mxu0 %vm1476_vm10, %v1509_v46 }
 0x16b   :  { %1250 = vmatpush1.bf16.msra.mxu1 %v1249_v35  ;;  %v1071_v35 = vld [vmem:[%s1782_s3] ss:$0 sm:$0xff]  ;;  %s1059_s3 = sshll.u32 %s1370_s21, 4  ;;  %s1060_s3 = int_to_ptr.vmem [resolvable:$true] %s1059_s3 }
 0x16c   :  { %1251 = vmatprep.subr.bf16.mxu1 %v1367_v13  ;;  %s1338_s22 = scalar_lea.vmem %s1060_s3, 32  ;;  %p1343_p1 = scmp.lt.s32.totalorder %s1060_s3, %s1060_s3 }
 0x16d   :  { %p1339_p0 = scmp.ne.s32.totalorder %s1060_s3, %s1338_s22  ;;  %p1344_p2 = scmp.lt.s32.totalorder %s1338_s22, %s1338_s22 }
 0x16f   :  { %1253 = vmatpush1.bf16.msra.mxu1 %v1252_v52  ;;  %p1345_p3 = por %p1344_p2, %p1343_p1 }
 0x170   :  { %1254 = vmatprep.subr.bf16.mxu1 %v1367_v13 }
 0x171   :  { %p1346_p4 = pnand %p1345_p3, %p1339_p0 }
 0x23a   :  { %v1163_v2 = vpop.f32.mrb[4].mxu0 }
 0x23b   :  { %v485_v3 = vmul.f32 0.17677669, %v1163_v2  ;;  %v475_v4 = vpop.f32.mrb[5].mxu0 }
 0x23c   :  { %v484_v5 = vmul.f32 0.17677669, %v475_v4 }
 0x23d   :  { %v490_v6 = vsel %vm486_vm11, %v485_v3, -inf }
 0x23e   :  { %491 = vmax.xlane.f32.xlu1 %v490_v6  ;;  %v487_v7 = vsel %vm486_vm11, %v484_v5, -inf }
 0x23f   :  { %488 = vmax.xlane.f32.xlu0 %v487_v7 }
 0x24f   :  { %1308 = vrot.lane.b32.xlu1 %v1307_v54, %s1364_s1  ;;  %v279_v54 = vld [vmem:[%s1781_s2 + $0x80] sm:$0xff] }
 0x253   :  { %1318 = vrot.lane.b32.xlu1 %v1317_v55, %s1365_s16  ;;  %v280_v55 = vld [vmem:[%s1781_s2 + $0x88] sm:$0xff] }
 0x254   :  { %v1255_v60 = vpack.c.bf16 %v280_v55, %v279_v54 }
 0x256   :  { %1256 = vmatpush1.bf16.msra.mxu1 %v1255_v60 }
 0x257   :  { %187 = vrot.lane.b32.xlu1 %v180_v62, %s1364_s1  ;;  %1257 = vmatprep.subr.bf16.mxu1 %v1367_v13  ;;  %v281_v62 = vld [vmem:[%s1781_s2 + $0x90] sm:$0xff] }
 0x25b   :  { %231 = vrot.lane.b32.xlu1 %v224_v63, %s1365_s16  ;;  %v282_v63 = vld [vmem:[%s1781_s2 + $0x98] sm:$0xff] }
 0x25c   :  { %v1258_v2 = vpack.c.bf16 %v282_v63, %v281_v62 }
 0x25e   :  { %1259 = vmatpush1.bf16.msra.mxu1 %v1258_v2 }
 0x25f   :  { %211 = vrot.lane.b32.xlu1 %v204_v9, %s1366_s17  ;;  %1290 = vmatprep.subr.bf16.mxu1 %v1367_v13 }
 0x2cb   :  { %v492_v36 = vpop.xlane.xlu1 %491 }
 0x2cc   :  { %v494_v37 = vsub.f32 %v485_v3, %v492_v36  ;;  %v489_v38 = vpop.xlane.xlu0 %488  ;;  %v181_v3 = vrot.slane %v1363_v21, 1 }
 0x2cd   :  { %v493_v39 = vsub.f32 %v484_v5, %v489_v38  ;;  %v225_v5 = vrot.slane %v1363_v21, 3 }
 0x2ce   :  { %v497_v41 = vmul.f32 1.442695, %v494_v37  ;;  %v182_v4 = vsel %vm173_vm7, %v179_v58, %v181_v3 }
 0x2cf   :  { %v495_v42 = vmul.f32 1.442695, %v493_v39  ;;  %v226_v6 = vsel %vm217_vm8, %v223_v59, %v225_v5  ;;  %v1309_v45 = vpop.permute.xlu1 %1308  ;;  %v387_v39 = vld [vmem:[%s1783_s4] sm:$0xff]  ;;  %v389_v5 = vld [vmem:[%s1783_s4 + $0x10] sm:$0xff] }
 0x2d0   :  { %v1311_v8 = vunpack.i.h.bf16 %v1309_v45 }
 0x2d1   :  { %1322 = vpow2.f32 %v495_v42 }
 0x2d2   :  { %1324 = vpow2.f32 %v497_v41  ;;  %v251_v19 = vsel %vm249_vm5, %v1470_v28, %v1311_v8 }
 0x2db   :  { %v1323_v43 = vpop.eup %1322 }
 0x2dc   :  { %v499_v47 = vsel %vm486_vm11, %v1323_v43, 0.0  ;;  %v1325_v48 = vpop.eup %1324 }
 0x2dd   :  { %500 = vadd.xlane.f32.xlu0 %v499_v47  ;;  %v502_v49 = vsel %vm486_vm11, %v1325_v48, 0.0 }
 0x2e1   :  { %503 = vadd.xlane.f32.xlu0 %v502_v49 }
 0x2f7   :  { %1313 = vrot.lane.b32.xlu0 %v1312_v56, %s1366_s17  ;;  %v1319_v56 = vpop.permute.xlu1 %1318 }
 0x2f8   :  { %v1320_v11 = vunpack.i.l.bf16 %v1319_v56  ;;  %v1321_v22 = vunpack.i.h.bf16 %v1319_v56 }
 0x2fb   :  { %209 = vrot.lane.b32.xlu0 %v1541_v0, %s1366_s17  ;;  %v1310_v0 = vunpack.i.l.bf16 %v1309_v45  ;;  %v188_v12 = vpop.permute.xlu1 %187 }
 0x2fc   :  { %v252_v23 = vsel %vm249_vm5, %v1499_v44, %v188_v12 }
 0x2fd   :  { %v250_v14 = vsel %vm249_vm5, %v1472_v29, %v1310_v0  ;;  %v390_v0 = vld [vmem:[%s1783_s4 + $0x18] sm:$0xff] }
 0x2ff   :  { %189 = vrot.lane.b32.xlu0 %v182_v4, %s1364_s1  ;;  %v232_v24 = vpop.permute.xlu1 %231 }
 0x303   :  { %233 = vrot.lane.b32.xlu0 %v226_v6, %s1365_s16  ;;  %v212_v34 = vpop.permute.xlu1 %211 }
 0x36a   :  { %v501_v53 = vpop.xlane.xlu0 %500 }
 0x36b   :  { %1326 = vrcp.f32 %v501_v53 }
 0x36e   :  { %v504_v7 = vpop.xlane.xlu0 %503 }
 0x36f   :  { %1328 = vrcp.f32 %v504_v7 }
 0x372   :  { %v1314_v9 = vpop.permute.xlu0 %1313 }
 0x373   :  { %v1316_v58 = vunpack.i.h.bf16 %v1314_v9  ;;  %v1315_v10 = vunpack.i.l.bf16 %v1314_v9 }
 0x375   :  { %v1327_v59 = vpop.eup %1326  ;;  %v254_v15 = vsel %vm70_vm0, %v250_v14, %v1315_v10  ;;  %v255_v20 = vsel %vm70_vm0, %v251_v19, %v1316_v58 }
 0x376   :  { %v210_v16 = vpop.permute.xlu0 %209  ;;  %v259_v17 = vsel %vm258_vm12, %v254_v15, %v1320_v11  ;;  %v507_v18 = vmul.f32 %v1327_v59, %v1323_v43  ;;  %v260_v27 = vsel %vm258_vm12, %v255_v20, %v1321_v22 }
 0x377   :  { %363 = vmatmul.mubr.f32.vlgmr.msra.gmra.mrb[0].mxu1 %v259_v17  ;;  %v256_v28 = vsel %vm70_vm0, %v252_v23, %v210_v16 }
 0x378   :  { %1073 = vmatprep.mubr.msk.f32.mxu1 %vm249_vm5, %v1523_v57  ;;  %1168 = vmatprep.mubr.msk.f32.mxu0 %vm486_vm11, %v507_v18  ;;  %v261_v32 = vsel %vm258_vm12, %v256_v28, %v232_v24 }
 0x379   :  { %v1329_v29 = vpop.eup %1328 }
 0x37a   :  { %v508_v25 = vmul.f32 %v1329_v29, %v1325_v48  ;;  %v190_v26 = vpop.permute.xlu0 %189 }
 0x37b   :  { %368 = vmatmul.mubr.f32.gmra.mrb[2].mxu1 %v260_v27  ;;  %v253_v57 = vsel %vm249_vm5, %v1492_v40, %v190_v26 }
 0x37c   :  { %1074 = vmatprep.mubr.msk.f32.mxu1 %vm249_vm5, %v1546_v1  ;;  %1169 = vmatmul.mubr.msk.f32.vlgmr.msra.gmra.mrb[6].mxu0 %vm486_vm11, %v508_v25  ;;  %v248_v1 = vsel %vm239_vm6, %v245_v61, %v247_v31  ;;  %v257_v30 = vsel %vm70_vm0, %v253_v57, %v212_v34  ;;  %vm1369_vm0 = vmmov 1  }
 0x37d   :  { %1275 = vmatpush3.bf16.xpose.msk.msra.mxu0 %vm1476_vm10, %v1509_v46  ;;  %1175 = vmatprep.mubr.msk.f32.mxu0 %vm249_vm5, %v1499_v44  ;;  %vm1282_vm1 = vmpackc.low %vm239_vm6, %vm1369_vm0 }
 0x37e   :  { %1277 = vmatprep.subr.bf16.mxu0 %v1509_v46  ;;  %v234_v33 = vpop.permute.xlu0 %233 }
 0x37f   :  { %373 = vmatmul.mubr.f32.gmra.mrb[4].mxu1 %v261_v32  ;;  %v262_v44 = vsel %vm258_vm12, %v257_v30, %v234_v33 }
 0x380   :  { %1075 = vmatprep.mubr.msk.f32.mxu1 %vm249_vm5, %v248_v1 }
 0x383   :  { %378 = vmatmul.mubr.f32.gmra.mrb[6].mxu1 %v262_v44 }
 0x384   :  { %1176 = vmatmul.mubr.msk.f32.vlgmr.msra.gmra.mrb[8].mxu0 %vm249_vm5, %v1492_v40  ;;  %1211 = vmatprep.mubr.msk.f32.mxu1 %vm1368_vm15, %v1363_v21 }
 0x385   :  { %1279 = vmatpush3.bf16.msra.mxu0 %v1509_v46  ;;  %v388_v46 = vld [vmem:[%s1783_s4 + $0x8] sm:$0xff] }
 0x386   :  { %1280 = vmatprep.subr.bf16.mxu0 %v1367_v13 }
 0x44a   :  { %v364_v61 = vpop.f32.mrb[0].mxu1 }
 0x44b   :  { %v365_v36 = vadd.f32 %v1071_v35, %v364_v61  ;;  %v366_v37 = vpop.f32.mrb[1].mxu1 }
 0x44d   :  { %v383_v38 = vmax.f32 %v365_v36, 0.0 }
 0x44e   :  { %v369_v41 = vpop.f32.mrb[2].mxu1 }
 0x44f   :  { %v370_v42 = vadd.f32 %v1071_v35, %v369_v41  ;;  %v371_v43 = vpop.f32.mrb[3].mxu1  ;;  %v1170_v40 = vpop.f32.mrb[6].mxu0  ;;  %v391_v49 = vmul.f32 %v387_v39, %v383_v38  ;;  %v804_v39 = vld [vmem:[%s1784_s5] sm:$0xff]  ;;  %v805_v41 = vld [vmem:[%s1784_s5 + $0x8] sm:$0xf] }
 0x450   :  { %v591_v47 = vsel %vm249_vm5, %v1170_v40, -inf  ;;  %v581_v48 = vpop.f32.mrb[7].mxu0 }
 0x451   :  { %v384_v50 = vmax.f32 %v370_v42, 0.0  ;;  %v590_v51 = vsel %vm249_vm5, %v581_v48, -inf  ;;  %v396_v63 = vsel %vm395_vm13, %v391_v49, -inf  ;;  %v889_v48 = vld [vmem:[%s1786_s7] sm:$0xff]  ;;  %v890_v49 = vld [vmem:[%s1786_s7 + $0x8] sm:$0xff] }
 0x452   :  { %v1694_v52 = vmax.f32 %v590_v51, %v591_v47  ;;  %v374_v54 = vpop.f32.mrb[4].mxu1  ;;  %v891_v51 = vld [vmem:[%s1786_s7 + $0x10] sm:$0xff] }
 0x453   :  { %v392_v55 = vmul.f32 %v388_v46, %v384_v50  ;;  %v375_v60 = vadd.f32 %v1071_v35, %v374_v54  ;;  %v376_v62 = vpop.f32.mrb[5].mxu1  ;;  %v1281_v46 = vpack.c.bf16 %v805_v41, %v804_v39  ;;  %v1291_v50 = vpack.c.bf16 %v890_v49, %v889_v48 }
 0x455   :  { %v397_v2 = vsel %vm395_vm13, %v392_v55, -inf  ;;  %v385_v3 = vmax.f32 %v375_v60, 0.0  ;;  %1292 = vmatpush3.bf16.msra.mxu1 %v1291_v50  ;;  %v893_v55 = vld [vmem:[%s1787_s8] sm:$0xff]  ;;  %v894_v60 = vld [vmem:[%s1787_s8 + $0x8] sm:$0xff] }
 0x456   :  { %v398_v4 = vmax.f32 %v396_v63, %v397_v2  ;;  %v379_v6 = vpop.f32.mrb[6].mxu1  ;;  %1293 = vmatprep.subr.bf16.mxu1 %v1367_v13  ;;  %v1285_v62 = vpack.c.bf16 %v894_v60, %v893_v55  ;;  %v895_v63 = vld [vmem:[%s1787_s8 + $0x10] sm:$0xff]  ;;  %v896_v2 = vld [vmem:[%s1787_s8 + $0x18] sm:$0xff] }
 0x457   :  { %v380_v45 = vadd.f32 %v1071_v35, %v379_v6  ;;  %v1177_v53 = vpop.f32.mrb[8].mxu0  ;;  %v381_v56 = vpop.f32.mrb[7].mxu1  ;;  %v393_v58 = vmul.f32 %v389_v5, %v385_v3  ;;  %v1288_v3 = vpack.c.bf16 %v896_v2, %v895_v63 }
 0x458   :  { %v399_v7 = vrot.slane %v398_v4, 4  ;;  %v688_v8 = vmul.f32 0.17677669, %v1177_v53  ;;  %v678_v9 = vpop.f32.mrb[9].mxu0  ;;  %v1088_v56 = vld [vmem:[%s1785_s6] ss:$0 sm:$0xff] }
 0x459   :  { %v386_v10 = vmax.f32 %v380_v45, 0.0  ;;  %v687_v11 = vmul.f32 0.17677669, %v678_v9  ;;  %v599_v16 = vsel %vm395_vm13, %v393_v58, -inf }
 0x45a   :  { %v400_v12 = vmax.f32 %v398_v4, %v399_v7  ;;  %v692_v14 = vsel %vm486_vm11, %v688_v8, -inf  ;;  %v593_v4 = vrot.slane %v1694_v52, 4 }
 0x45b   :  { %v394_v59 = vmul.f32 %v390_v0, %v386_v10  ;;  %693 = vmax.xlane.f32.xlu0 %v692_v14  ;;  %v689_v15 = vsel %vm486_vm11, %v687_v11, -inf }
 0x45c   :  { %690 = vmax.xlane.f32.xlu1 %v689_v15  ;;  %v401_v18 = vrot.slane %v400_v12, 2  ;;  %v594_v5 = vmax.f32 %v1694_v52, %v593_v4 }
 0x45d   :  { %v600_v17 = vsel %vm395_vm13, %v394_v59, -inf }
 0x45e   :  { %v601_v19 = vmax.f32 %v599_v16, %v600_v17  ;;  %v402_v22 = vmax.f32 %v400_v12, %v401_v18  ;;  %v595_v7 = vrot.slane %v594_v5, 2 }
 0x460   :  { %v602_v20 = vrot.slane %v601_v19, 4  ;;  %v403_v24 = vrot.slane %v402_v22, 1 }
 0x462   :  { %v603_v29 = vmax.f32 %v601_v19, %v602_v20  ;;  %v404_v27 = vmax.f32 %v402_v22, %v403_v24 }
 0x464   :  { %v604_v23 = vrot.slane %v603_v29, 2 }
 0x466   :  { %v605_v25 = vmax.f32 %v603_v29, %v604_v23  ;;  %v1093_v29 = vld [vmem:[%s1788_s9] ss:$0 sm:$0xff] }
 0x468   :  { %v606_v26 = vrot.slane %v605_v25, 1 }
 0x46a   :  { %v607_v28 = vmax.f32 %v605_v25, %v606_v26 }
 0x46c   :  { %v802_v31 = vsel %vm801_vm14, %v404_v27, %v607_v28 }
 0x4e8   :  { %v694_v57 = vpop.xlane.xlu0 %693 }
 0x4e9   :  { %v696_v32 = vsub.f32 %v688_v8, %v694_v57  ;;  %v691_v33 = vpop.xlane.xlu1 %690 }
 0x4ea   :  { %v695_v1 = vsub.f32 %v687_v11, %v691_v33  ;;  %v596_v11 = vmax.f32 %v594_v5, %v595_v7 }
 0x4eb   :  { %v699_v34 = vmul.f32 1.442695, %v696_v32 }
 0x4ec   :  { %v697_v30 = vmul.f32 1.442695, %v695_v1  ;;  %v597_v14 = vrot.slane %v596_v11, 1 }
 0x4ed   :  { %1330 = vpow2.f32 %v699_v34 }
 0x4ee   :  { %1332 = vpow2.f32 %v697_v30  ;;  %v598_v16 = vmax.f32 %v596_v11, %v597_v14 }
 0x4f7   :  { %v1331_v44 = vpop.eup %1330 }
 0x4f8   :  { %v1333_v35 = vpop.eup %1332  ;;  %v704_v61 = vsel %vm486_vm11, %v1331_v44, 0.0 }
 0x4f9   :  { %705 = vadd.xlane.f32.xlu1 %v704_v61  ;;  %v701_v36 = vsel %vm486_vm11, %v1333_v35, 0.0 }
 0x4fa   :  { %702 = vadd.xlane.f32.xlu0 %v701_v36 }
 0x586   :  { %v706_v37 = vpop.xlane.xlu1 %705 }
 0x587   :  { %1334 = vrcp.f32 %v706_v37  ;;  %v703_v38 = vpop.xlane.xlu0 %702 }
 0x588   :  { %1336 = vrcp.f32 %v703_v38 }
 0x591   :  { %v1335_v42 = vpop.eup %1334 }
 0x592   :  { %v1337_v43 = vpop.eup %1336  ;;  %v710_v47 = vmul.f32 %v1335_v42, %v1331_v44 }
 0x593   :  { %v709_v40 = vmul.f32 %v1337_v43, %v1333_v35 }
 0x595   :  { %1182 = vmatprep.mubr.msk.f32.mxu0 %vm486_vm11, %v709_v40 }
 0x596   :  { %1183 = vmatmul.mubr.msk.f32.vlgmr.msra.gmra.mrb[10].mxu0 %vm486_vm11, %v710_v47 }
 0x597   :  { %1283 = vmatpush3.bf16.msk.msra.mxu0 %vm1282_vm1, %v1281_v46  ;;  %1189 = vmatprep.mubr.msk.f32.mxu0 %vm1368_vm15, %v1363_v21 }
 0x598   :  { %1284 = vmatprep.subr.bf16.mxu0 %v1367_v13 }
 0x59a   :  { %1190 = vmatmul.mubr.msk.f32.vlgmr.msra.gmra.mrb[12].mxu0 %vm395_vm13, %v802_v31 }
 0x59b   :  { %1200 = vmatprep.mubr.msk.f32.mxu0 %vm1368_vm15, %v1363_v21  ;;  %v892_v21 = vld [vmem:[%s1786_s7 + $0x18] sm:$0xff]  ;;  %1286 = vmatpush3.bf16.msra.mxu0 %v1285_v62 }
 0x59c   :  { %v1294_v54 = vpack.c.bf16 %v892_v21, %v891_v51  ;;  %1287 = vmatprep.subr.bf16.mxu0 %v1367_v13 }
 0x59e   :  { %1295 = vmatpush3.bf16.msra.mxu1 %v1294_v54 }
 0x59f   :  { %1289 = vmatpush3.bf16.msra.mxu0 %v1288_v3 }
 0x669   :  { %v1184_v6 = vpop.f32.mrb[10].mxu0 }
 0x66a   :  { %v793_v45 = vsel %vm249_vm5, %v1184_v6, -inf  ;;  %v783_v53 = vpop.f32.mrb[11].mxu0 }
 0x66b   :  { %v792_v13 = vsel %vm249_vm5, %v783_v53, -inf }
 0x66c   :  { %v794_v0 = vmax.f32 %v792_v13, %v793_v45 }
 0x66d   :  { %v885_v8 = vpop.f32.mrb[12].mxu0 }
 0x66e   :  { %v795_v9 = vrot.slane %v794_v0, 4  ;;  %v886_v58 = vadd.f32 %v1088_v56, %v885_v8  ;;  %v1191_v10 = vpop.f32.mrb[13].mxu0 }
 0x670   :  { %v796_v12 = vmax.f32 %v794_v0, %v795_v9  ;;  %1212 = vmatmul.mubr.msk.f32.vlgmr.msra.gmra.mrb[8].mxu1 %vm249_vm5, %v886_v58 }
 0x672   :  { %v797_v52 = vrot.slane %v796_v12, 2 }
 0x674   :  { %v798_v59 = vmax.f32 %v796_v12, %v797_v52 }
 0x676   :  { %v799_v15 = vrot.slane %v798_v59, 1 }
 0x678   :  { %v800_v17 = vmax.f32 %v798_v59, %v799_v15 }
 0x67a   :  { %v803_v18 = vsel %vm801_vm14, %v598_v16, %v800_v17 }
 0x67b   :  { %1201 = vmatmul.mubr.msk.f32.vlgmr.msra.gmra.mrb[14].mxu0 %vm249_vm5, %v803_v18 }
 0x743   :  { %v1039_v19 = vpop.f32.mrb[8].mxu1 }
 0x744   :  { %v1213_v20 = vpop.f32.mrb[9].mxu1 }
 0x74e   :  { %v966_v22 = vpop.f32.mrb[14].mxu0 }
 0x74f   :  { %v1040_v23 = vadd.f32 %v1039_v19, %v966_v22  ;;  %v1202_v24 = vpop.f32.mrb[15].mxu0 }
 0x751   :  { %v1050_v25 = vadd.f32 %v1093_v29, %v1040_v23 }
 0x753   :  { %1052 = vst.msk [vmem:[#allocation2] sm:$0x3] %vm1051_vm2, %v1050_v25 }
 0x754   :  { %1349 = shalt.err (!%p1346_p4)
}
 0x755   :  { %s1350_s4 = scalar_lea.hbm %s1789_s10, 32 }
 0x756   :  { %p1351_p5 = scmp.ne.s32.totalorder %s1789_s10, %s1350_s4  ;;  %p1354_p6 = scmp.lt.u32.totalorder %s1350_s4, %s1789_s10 }
 0x758   :  { %p1356_p7 = pnand %p1354_p6, %p1351_p5 }
 0x75a   :  { %1359 = shalt.err (!%p1356_p7)
}
 0x75b   :  { %1062 = dma.vmem_to_hbm [thread:$0]  %s1060_s3, 32, %s1789_s10, [#allocation3]  }
 0x75c   :  { %1360 = dma.done.wait [#allocation3], 32  }
 0x75d   :  { %1361 = vsyncadd [#allocation3], 4294967264 }
 0x75e   :  { %1066 = vsyncpa [#allocation3], 1 }

</bundles_post_ra>
